<compile_context>
chip_gen: v5e
topology: v5e:2x2
jax: 0.10.0
libtpu: 0.0.40
codegen_flags: <defaults>
</compile_context>

<pallas_src>
import jax
import jax.numpy as jnp
from jax import lax
from jax.experimental import pallas as pl
from jax.experimental.pallas import tpu as pltpu


_TARGET_BLOCK_BYTES = 8 * 1024 * 1024  # ~8 MiB per row block (16 MiB double-buffered)


def _round_up(x, m):
    return ((x + m - 1) // m) * m


def _choose_rows(n_rows, hidden, seq_bytes, masked):
    """Row tile: ~8 MiB of streamed bytes per block, multiple of 128, capped by N."""
    lane_h = _round_up(hidden, 128)
    # When masked, the (tn, 1) mask tile lane-pads to (tn, 128) in VMEM; count it.
    row_bytes = lane_h * seq_bytes + (128 * seq_bytes if masked else 0)
    rows = _TARGET_BLOCK_BYTES // row_bytes
    rows = max(128, (rows // 128) * 128)
    return min(rows, _round_up(n_rows, 128))


def _choose_chunk(hidden, seq_bytes):
    """Rows per in-kernel accumulation step (keeps the f32 working set in vregs)."""
    budget = 128 * 1024 if seq_bytes >= 4 else 64 * 1024  # narrower dtypes widen to f32
    c = 128
    while c > 8 and c * hidden * 4 > budget:
        c //= 2
    return c  # 8..128; always divides tn (tn is a multiple of 128)


def _vmem_limit_bytes(tn, hidden, seq_bytes, masked):
    lane_h = _round_up(hidden, 128)
    est = 2 * tn * lane_h * seq_bytes        # seq block, double-buffered
    est += 2 * 8 * lane_h * 4                # (8, H) f32 partial-sum out block, x2
    est += 8 * lane_h * 4                    # f32 accumulator scratch
    if masked:
        est += 2 * tn * 128 * seq_bytes      # (tn, 1) mask tile lane-pads to 128
    # Real estimate + headroom for Mosaic internal scratch; stay well below the
    # 64 MiB physical VMEM of v7x. No artificial floor.
    return int(min(48 * 1024 * 1024, est + est // 2 + (4 << 20)))


def _make_kernel(*, n_rows, tn, th, bps, nshards, chunk, masked):
    """Row-sum kernel. Emits per-shard (8, th) f32 partial sums (no division)."""
    total_blocks = bps * nshards
    ragged = (n_rows % tn) != 0
    tail_valid = n_rows - (total_blocks - 1) * tn  # valid rows in the final block

    def accumulate(seq_ref, msk_ref, acc_ref, mask_tail_rows):
        n_chunks = tn // chunk

        def chunk_body(c, carry):
            r0 = pl.multiple_of(c * chunk, chunk)
            sblk = seq_ref[pl.ds(r0, chunk), :]                       # (chunk, th)
            w = sblk.reshape(chunk // 8, 8, th)
            if masked:
                mblk = msk_ref[pl.ds(r0, chunk), :]                   # (chunk, 1)
                w = w * mblk.reshape(chunk // 8, 8, 1)                # row weights
            if mask_tail_rows:
                # Block-local row index; zero out rows beyond the true N. The
                # where() also squashes any NaN garbage from the padded read.
                ridx = (lax.broadcasted_iota(jnp.int32, (chunk // 8, 8, 1), 0) * 8
                        + lax.broadcasted_iota(jnp.int32, (chunk // 8, 8, 1), 1)
                        + r0)
                w = jnp.where(ridx < tail_valid, w, 0)
            # Chunked accumulation: bf16 -> f32 widening stays inside vregs.
            acc_ref[...] += jnp.sum(w, axis=0, dtype=jnp.float32)     # (8, th) VPU adds
            return carry

        lax.fori_loop(0, n_chunks, chunk_body, 0)

    def kernel(*args):
        if masked:
            seq_ref, msk_ref, out_ref, acc_ref = args
        else:
            seq_ref, out_ref, acc_ref = args
            msk_ref = None

        i = pl.program_id(1)  # reduction (row-block) axis, "arbitrary", innermost

        @pl.when(i == 0)
        def _():
            acc_ref[...] = jnp.zeros_like(acc_ref)

        if ragged:
            is_tail = jnp.logical_and(pl.program_id(0) == nshards - 1, i == bps - 1)

            @pl.when(is_tail)
            def _():
                accumulate(seq_ref, msk_ref, acc_ref, True)

            @pl.when(jnp.logical_not(is_tail))
            def _():
                accumulate(seq_ref, msk_ref, acc_ref, False)
        else:
            accumulate(seq_ref, msk_ref, acc_ref, False)

        @pl.when(i == bps - 1)
        def _():
            out_ref[...] = acc_ref[...]

    return kernel


def avg_readout(seq, msk=None, *, tile_rows=None):
    """Pallas implementation of AvgReadout.forward(seq, msk). Returns shape (H,)."""
    N, H = seq.shape
    seq_bytes = jnp.dtype(seq.dtype).itemsize
    masked = msk is not None

    if tile_rows is None:
        tn = _choose_rows(N, H, seq_bytes, masked)
    else:  # testing override
        tn = min(max(128, _round_up(tile_rows, 128)), _round_up(N, 128))
    chunk = _choose_chunk(H, seq_bytes)

    total_blocks = pl.cdiv(N, tn)
    # 2-way row split on the leading "parallel" axis (v7x two-TC sharding; free
    # on single-core chips). Only when the blocks split evenly, so no shard ever
    # addresses an out-of-range row block.
    nshards = 2 if (total_blocks % 2 == 0 and total_blocks >= 2) else 1
    bps = total_blocks // nshards
    grid = (nshards, bps)

    seq_spec = pl.BlockSpec((tn, H), lambda s, i: (s * bps + i, 0))
    out_spec = pl.BlockSpec((8, H), lambda s, i: (s, 0))
    out_shape = jax.ShapeDtypeStruct((nshards * 8, H), jnp.float32)
    scratch = [pltpu.VMEM((8, H), jnp.float32)]
    cparams = pltpu.CompilerParams(
        dimension_semantics=("parallel", "arbitrary"),
        vmem_limit_bytes=_vmem_limit_bytes(tn, H, seq_bytes, masked),
    )
    kernel = _make_kernel(n_rows=N, tn=tn, th=H, bps=bps, nshards=nshards,
                          chunk=chunk, masked=masked)

    if not masked:
        sums = pl.pallas_call(
            kernel,
            out_shape=out_shape,
            grid_spec=pltpu.PrefetchScalarGridSpec(
                num_scalar_prefetch=0,
                grid=grid,
                in_specs=[seq_spec],
                out_specs=out_spec,
                scratch_shapes=scratch,
            ),
            compiler_params=cparams,
        )(seq)
        return (jnp.sum(sums, axis=0) / N).astype(seq.dtype)

    # Masked path. Mask rides along as (N, 1) in seq's dtype (row-aligned with
    # the seq tiles); no full-array padding anywhere.
    msk_flat = msk.reshape(-1)
    msk2d = msk_flat.astype(seq.dtype).reshape(N, 1)
    msk_spec = pl.BlockSpec((tn, 1), lambda s, i: (s * bps + i, 0))

    sums = pl.pallas_call(
        kernel,
        out_shape=out_shape,
        grid_spec=pltpu.PrefetchScalarGridSpec(
            num_scalar_prefetch=0,
            grid=grid,
            in_specs=[seq_spec, msk_spec],
            out_specs=out_spec,
            scratch_shapes=scratch,
        ),
        compiler_params=cparams,
    )(seq, msk2d)
    # Denominator is an O(N) scalar reduction; done in plain XLA (negligible next
    # to the N*H streaming pass). All-zero mask -> inf/nan, matching torch.
    denom = jnp.sum(msk_flat.astype(jnp.float32))
    return (jnp.sum(sums, axis=0) / denom).astype(seq.dtype)


if __name__ == "__main__":
    key = jax.random.PRNGKey(0)
    k1, k2, k3, k4 = jax.random.split(key, 4)

    # --- Case 1: small single-block shapes (N=16 nodes, H=32 features) --------
    N, H = 16, 32
    seq = jax.random.normal(k1, (N, H), dtype=jnp.float32)
    msk = (jax.random.uniform(k2, (N,)) > 0.3).astype(jnp.float32)

    out_mean = avg_readout(seq)
    out_masked = avg_readout(seq, msk)
    jax.block_until_ready((out_mean, out_masked))

    ref_mean = jnp.mean(seq, axis=0)
    ref_masked = jnp.sum(seq * msk[:, None], axis=0) / jnp.sum(msk)
    assert out_mean.shape == (H,) and out_masked.shape == (H,)
    assert jnp.allclose(out_mean, ref_mean, atol=1e-5, rtol=1e-5)
    assert jnp.allclose(out_masked, ref_masked, atol=1e-5, rtol=1e-5)

    # --- Case 2: ragged tail + multi-block reduction + 2-shard parallel axis ---
    N2, H2 = 300, 256
    seq2 = jax.random.normal(k3, (N2, H2), dtype=jnp.float32)
    msk2 = (jax.random.uniform(k4, (N2,)) > 0.4).astype(jnp.float32)

    out_mean2 = avg_readout(seq2, tile_rows=128)          # 3 row blocks, 1 shard, ragged
    out_masked2 = avg_readout(seq2, msk2, tile_rows=256)  # 2 row blocks, 2 shards, ragged
    jax.block_until_ready((out_mean2, out_masked2))

    ref_mean2 = jnp.mean(seq2, axis=0)
    ref_masked2 = jnp.sum(seq2 * msk2[:, None], axis=0) / jnp.sum(msk2)
    assert jnp.allclose(out_mean2, ref_mean2, atol=1e-5, rtol=1e-5)
    assert jnp.allclose(out_masked2, ref_masked2, atol=1e-5, rtol=1e-5)

    print("KERNEL_OK")
</pallas_src>

<mosaic_0001>
module attributes {stable_mosaic.version = 11 : i64} {
  func.func @kernel(%arg0: i32, %arg1: i32, %arg2: memref<128x32xf32, #tpu.memory_space<vmem>>, %arg3: memref<8x32xf32, #tpu.memory_space<vmem>>, %arg4: memref<8x32xf32, #tpu.memory_space<vmem>>) attributes {dimension_semantics = [#tpu.dimension_semantics<parallel>, #tpu.dimension_semantics<arbitrary>], iteration_bounds = array<i64: 1, 1>, scalar_prefetch = 0 : i64, scratch_operands = 1 : i64, tpu.core_type = #tpu.core_type<tc>, window_params = [{transform_indices = @transform_0, window_bounds = array<i64: 128, 32>}, {transform_indices = @transform_1, window_bounds = array<i64: 8, 32>}]} {
    %c0_i32 = arith.constant 0 : i32
    %0 = arith.cmpi eq, %arg1, %c0_i32 : i32
    %1 = arith.extui %0 : i1 to i32
    %c0_i32_0 = arith.constant 0 : i32
    %2 = arith.cmpi ne, %1, %c0_i32_0 : i32
    scf.if %2 {
      %cst = arith.constant 0.000000e+00 : f32
      %14 = vector.broadcast %cst : f32 to vector<8x32xf32>
      %c0 = arith.constant 0 : index
      %c0_7 = arith.constant 0 : index
      %15 = vector.load %arg4[%c0, %c0_7] : memref<8x32xf32, #tpu.memory_space<vmem>>, vector<8x32xf32>
      tpu.vector_store %arg4[%c0, %c0_7], %14 {strides = array<i32>} : memref<8x32xf32, #tpu.memory_space<vmem>>, vector<8x32xf32>,
    } else {
    }
    %c0_i32_1 = arith.constant 0 : i32
    %3 = arith.cmpi eq, %arg0, %c0_i32_1 : i32
    %c0_i32_2 = arith.constant 0 : i32
    %4 = arith.cmpi eq, %arg1, %c0_i32_2 : i32
    %5 = arith.andi %3, %4 : i1
    %6 = arith.extui %5 : i1 to i32
    %c0_i32_3 = arith.constant 0 : i32
    %7 = arith.cmpi ne, %6, %c0_i32_3 : i32
    scf.if %7 {
      %c0_i32_7 = arith.constant 0 : i32
      %c128_i32 = arith.constant 128 : i32
      %14 = arith.muli %c0_i32_7, %c128_i32 : i32
      %15 = tpu.assume_multiple %14, 128 : i32
      %16 = arith.index_cast %15 : i32 to index
      %c0 = arith.constant 0 : index
      %17 = vector.load %arg2[%16, %c0] : memref<128x32xf32, #tpu.memory_space<vmem>>, vector<128x32xf32>
      %18 = vector.shape_cast %17 : vector<128x32xf32> to vector<16x8x32xf32>
      %19 = tpu.iota {dimensions = array<i32: 0>} : vector<16x8x1xi32>
      %c8_i32 = arith.constant 8 : i32
      %20 = vector.broadcast %c8_i32 : i32 to vector<16x8x1xi32>
      %21 = arith.muli %19, %20 : vector<16x8x1xi32>
      %22 = tpu.iota {dimensions = array<i32: 1>} : vector<16x8x1xi32>
      %23 = arith.addi %21, %22 : vector<16x8x1xi32>
      %24 = vector.broadcast %15 : i32 to vector<16x8x1xi32>
      %25 = arith.addi %23, %24 : vector<16x8x1xi32>
      %c16_i32 = arith.constant 16 : i32
      %26 = vector.broadcast %c16_i32 : i32 to vector<16x8x1xi32>
      %27 = arith.cmpi slt, %25, %26 : vector<16x8x1xi32>
      %c0_i32_8 = arith.constant 0 : i32
      %28 = arith.sitofp %c0_i32_8 : i32 to f32
      %29 = vector.shape_cast %27 : vector<16x8x1xi1> to vector<16x8x1xi1>
      %30 = vector.broadcast %29 : vector<16x8x1xi1> to vector<16x8x32xi1>
      %31 = vector.broadcast %28 : f32 to vector<16x8x32xf32>
      %32 = arith.select %30, %18, %31 : vector<16x8x32xi1>, vector<16x8x32xf32>
      %c0_9 = arith.constant 0 : index
      %c0_10 = arith.constant 0 : index
      %33 = vector.load %arg4[%c0_9, %c0_10] : memref<8x32xf32, #tpu.memory_space<vmem>>, vector<8x32xf32>
      %cst = arith.constant dense<0.000000e+00> : vector<8x32xf32>
      %34 = vector.multi_reduction <add>, %32, %cst [0] : vector<16x8x32xf32> to vector<8x32xf32>
      %35 = arith.addf %33, %34 : vector<8x32xf32>
      %c0_11 = arith.constant 0 : index
      %c0_12 = arith.constant 0 : index
      %36 = vector.load %arg4[%c0_11, %c0_12] : memref<8x32xf32, #tpu.memory_space<vmem>>, vector<8x32xf32>
      tpu.vector_store %arg4[%c0_11, %c0_12], %35 {strides = array<i32>} : memref<8x32xf32, #tpu.memory_space<vmem>>, vector<8x32xf32>,
      %c1_i32 = arith.constant 1 : i32
    } else {
    }
    %true = arith.constant true
    %8 = arith.xori %5, %true : i1
    %9 = arith.extui %8 : i1 to i32
    %c0_i32_4 = arith.constant 0 : i32
    %10 = arith.cmpi ne, %9, %c0_i32_4 : i32
    scf.if %10 {
      %c0_i32_7 = arith.constant 0 : i32
      %c128_i32 = arith.constant 128 : i32
      %14 = arith.muli %c0_i32_7, %c128_i32 : i32
      %15 = tpu.assume_multiple %14, 128 : i32
      %16 = arith.index_cast %15 : i32 to index
      %c0 = arith.constant 0 : index
      %17 = vector.load %arg2[%16, %c0] : memref<128x32xf32, #tpu.memory_space<vmem>>, vector<128x32xf32>
      %18 = vector.shape_cast %17 : vector<128x32xf32> to vector<16x8x32xf32>
      %c0_8 = arith.constant 0 : index
      %c0_9 = arith.constant 0 : index
      %19 = vector.load %arg4[%c0_8, %c0_9] : memref<8x32xf32, #tpu.memory_space<vmem>>, vector<8x32xf32>
      %cst = arith.constant dense<0.000000e+00> : vector<8x32xf32>
      %20 = vector.multi_reduction <add>, %18, %cst [0] : vector<16x8x32xf32> to vector<8x32xf32>
      %21 = arith.addf %19, %20 : vector<8x32xf32>
      %c0_10 = arith.constant 0 : index
      %c0_11 = arith.constant 0 : index
      %22 = vector.load %arg4[%c0_10, %c0_11] : memref<8x32xf32, #tpu.memory_space<vmem>>, vector<8x32xf32>
      tpu.vector_store %arg4[%c0_10, %c0_11], %21 {strides = array<i32>} : memref<8x32xf32, #tpu.memory_space<vmem>>, vector<8x32xf32>,
      %c1_i32 = arith.constant 1 : i32
    } else {
    }
    %c0_i32_5 = arith.constant 0 : i32
    %11 = arith.cmpi eq, %arg1, %c0_i32_5 : i32
    %12 = arith.extui %11 : i1 to i32
    %c0_i32_6 = arith.constant 0 : i32
    %13 = arith.cmpi ne, %12, %c0_i32_6 : i32
    scf.if %13 {
      %c0 = arith.constant 0 : index
      %c0_7 = arith.constant 0 : index
      %14 = vector.load %arg4[%c0, %c0_7] : memref<8x32xf32, #tpu.memory_space<vmem>>, vector<8x32xf32>
      %c0_8 = arith.constant 0 : index
      %c0_9 = arith.constant 0 : index
      %15 = vector.load %arg3[%c0_8, %c0_9] : memref<8x32xf32, #tpu.memory_space<vmem>>, vector<8x32xf32>
      tpu.vector_store %arg3[%c0_8, %c0_9], %14 {strides = array<i32>} : memref<8x32xf32, #tpu.memory_space<vmem>>, vector<8x32xf32>,
    } else {
    }
    return
  }
  func.func @transform_0(%arg0: i32, %arg1: i32) -> (i32, i32) {
    %c1_i32 = arith.constant 1 : i32
    %0 = arith.muli %arg0, %c1_i32 : i32
    %1 = arith.addi %0, %arg1 : i32
    %c0_i32 = arith.constant 0 : i32
    %c0_i32_0 = arith.constant 0 : i32
    return %1, %c0_i32 : i32, i32
  }
  func.func @transform_1(%arg0: i32, %arg1: i32) -> (i32, i32) {
    %c0_i32 = arith.constant 0 : i32
    %c0_i32_0 = arith.constant 0 : i32
    return %arg0, %c0_i32 : i32, i32
  }
}

</mosaic_0001>

<bundles_post_ra>
// kernel: tpu_custom_call.1
= control target key start
LH: loop header
LB: loop body
LE: loop exit
PB: predicated region body
PF: predicated region fallthrough
CT: control target
= control target key end

     0   :  { %6 = vsyncpa [#allocation4], 0  ;;  %s358_s0 = inlined_call_operand.hbm [shape: f32[16,32], index: 0, kind: input, shape index: {}]   ;;  %s359_s1 = inlined_call_operand.hbm [shape: f32[8,32], index: 1, kind: output, shape index: {}]  }
   0x1   :  { %7 = vsyncpa [#allocation5], 0 }
   0x2   :  { %16 = vsyncadd [#allocation4], 1792  ;;  %s21_s8 = sshll.u32 %s358_s0, 4  ;;  %s332_s9 = smov [#allocation3]   ;;  %s22_s8 = int_to_ptr.hbm [resolvable:$true] %s21_s8 }
   0x3   :  { %s23_s10 = sshll.u32 %s332_s9, 4  ;;  %s333_s11 = smov 128   ;;  %s24_s10 = int_to_ptr.vmem [resolvable:$true] %s23_s10 }
   0x4   :  { %s334_s12 = smov 8  }
   0x5   :  { %29 = dma.hbm_to_vmem [thread:$0]  %s22_s8, 256, %s24_s10, [#allocation4], %s333_s11, %s333_s11, %s334_s12  }
   0x6   :  { %328 = dma.done.wait [#allocation4], 2048  }
   0x7   :  { %329 = vsyncadd [#allocation4], 4294965248  ;;  %vm42_vm0 = vcmask 261120   ;;  %v335_v0 = vmov 0.0   ;;  %v49_v1 = vld [vmem:[#allocation3] sm:$0xff]  ;;  %v50_v2 = vld [vmem:[#allocation3 + $0x8] sm:$0xff] }
   0x8   :  { %43 = vst.msk [vmem:[#allocation2] sm:$0xff] %vm42_vm0, %v335_v0  ;;  %v165_v4 = vsel %vm42_vm0, %v49_v1, 0.0  ;;  %v166_v5 = vsel %vm42_vm0, %v50_v2, 0.0  ;;  %s336_s0 = smov [#allocation6]   ;;  %s265_s16 = sshll.u32 %s359_s1, 4  ;;  %s266_s16 = int_to_ptr.hbm [resolvable:$true] %s265_s16 }
   0x9   :  { %v167_v6 = vadd.f32 %v166_v5, %v165_v4  ;;  %s263_s13 = sshll.u32 %s336_s0, 4  ;;  %s264_s13 = int_to_ptr.vmem [resolvable:$true] %s263_s13 }
   0xf   :  { %v163_v3 = vld [vmem:[#allocation2] sm:$0xff] }
  0x10   :  { %v196_v7 = vadd.f32 %v167_v6, %v163_v3 }
  0x12   :  { %197 = vst.msk [vmem:[#allocation2] sm:$0xff] %vm42_vm0, %v196_v7 }
  0x19   :  { %v255_v8 = vld [vmem:[#allocation2] sm:$0xff] }
  0x1a   :  { %257 = vst.msk [vmem:[#allocation6] sm:$0xff] %vm42_vm0, %v255_v8 }
  0x1b   :  { %268 = dma.vmem_to_hbm [thread:$0]  %s264_s13, 128, %s266_s16, [#allocation5]  }
  0x1c   :  { %330 = dma.done.wait [#allocation5], 128  }
  0x1d   :  { %331 = vsyncadd [#allocation5], 4294967168 }
  0x1e   :  { %273 = vsyncpa [#allocation4], 1 }
  0x1f   :  { %274 = vsyncpa [#allocation5], 1 }

</bundles_post_ra>
